<compile_context>
chip_gen: v6e
topology: v6e:2x2x1
jax: 0.10.0
libtpu: 0.0.40
codegen_flags: <defaults>
</compile_context>

<pallas_src>
import functools
import math

import jax
import jax.numpy as jnp
from jax import lax
from jax.experimental import pallas as pl
from jax.experimental.pallas import tpu as pltpu


def _round_up(x, m):
    return ((x + m - 1) // m) * m


def _flash_head_kernel(q_ref, k_ref, v_ref, o_ref, m_sc, l_sc, acc_sc,
                       *, scale, s_real, tk, n_kv, mask_tail, bf16_exp):
    """Full attention for one (batch/head-block, q-tile) with K/V resident.

    q_ref: (1, tq, Dh)     k_ref/v_ref: (1, Sk_pad, Dh)   o_ref: (1, tq, Dh)
    m_sc/l_sc: (tq, 1) f32 running max / denom;  acc_sc: (tq, Dh) f32 accumulator.
    """
    m_sc[...] = jnp.full(m_sc.shape, -1e30, m_sc.dtype)
    l_sc[...] = jnp.zeros(l_sc.shape, l_sc.dtype)
    acc_sc[...] = jnp.zeros(acc_sc.shape, acc_sc.dtype)

    # Scale folded into q ONCE per q tile (not per kv step); native MXU dtype.
    q = q_ref[0] * jnp.asarray(scale, q_ref.dtype)                  # (tq, Dh)

    def kv_step(start, masked):
        k = k_ref[0, pl.ds(start, tk), :]                           # (tk, Dh)
        v = v_ref[0, pl.ds(start, tk), :]                           # (tk, Dh)

        # (tq, tk) scores: contract over the head dim directly (no k.T relayout).
        s = lax.dot_general(q, k, dimension_numbers=(((1,), (1,)), ((), ())),
                            preferred_element_type=jnp.float32)

        if masked:  # static branch: only the ragged tail tile pays for the mask
            key_pos = start + lax.broadcasted_iota(jnp.int32, (1, tk), 1)
            s = jnp.where(key_pos < s_real, s, -1e30)
        # NOTE: a tile can never be fully masked (the tail always holds >=1 real
        # key), so exp(-1e30 - m) == 0 and stats stay clean.

        m_prev = m_sc[...]
        m_new = jnp.maximum(m_prev, jnp.max(s, axis=-1, keepdims=True))
        alpha = jnp.exp(m_prev - m_new)
        z = s - m_new
        if bf16_exp:
            # bf16 EUP exp on v6e/v7x (p is cast to bf16 for the PV matmul anyway).
            # On v5e (no bf16 EUP) pass f32 inputs so this path stays f32.
            p = jnp.exp(z.astype(jnp.bfloat16))
        else:
            p = jnp.exp(z)
        l_sc[...] = alpha * l_sc[...] + jnp.sum(p, axis=-1, keepdims=True,
                                                dtype=jnp.float32)
        acc_sc[...] = alpha * acc_sc[...] + jnp.dot(
            p.astype(v.dtype), v, preferred_element_type=jnp.float32)
        m_sc[...] = m_new

    n_full = n_kv - 1 if mask_tail else n_kv
    if n_full > 0:
        @pl.loop(0, n_full)
        def _(i):
            kv_step(pl.multiple_of(i * tk, tk), False)
    if mask_tail:
        kv_step((n_kv - 1) * tk, True)

    # Exact normalization (runs once per q tile — off the hot loop).
    o_ref[0] = (acc_sc[...] / l_sc[...]).astype(o_ref.dtype)


def mha_attention_core(q, k, v, *, num_head_blocks, head_dim, tq=512, tk=512):
    """q, k, v: (G, S, Dm) with Dm = num_head_blocks * head_dim -> (G, S, Dm).

    Heads are addressed as `head_dim`-wide column blocks of the last dim; when
    num_head_blocks == 1 the last dim IS the head dim (no 128-alignment needed).
    """
    G, S, Dm = q.shape
    assert Dm == num_head_blocks * head_dim
    scale = 1.0 / math.sqrt(head_dim)

    # Sublane-aligned sequence tiles (start large; clamp to S).
    tq = max(8, min(_round_up(tq, 8), _round_up(S, 8)))
    tk = max(8, min(_round_up(tk, 8), _round_up(S, 8)))
    sq_p, sk_p = _round_up(S, tq), _round_up(S, tk)
    n_q, n_kv = sq_p // tq, sk_p // tk
    mask_tail = sk_p != S

    def pad_seq(t, s_p):
        return t if s_p == S else jnp.pad(t, ((0, 0), (0, s_p - S), (0, 0)))

    qp, kp, vp = pad_seq(q, sq_p), pad_seq(k, sk_p), pad_seq(v, sk_p)

    bf16_exp = q.dtype == jnp.bfloat16

    kernel = functools.partial(
        _flash_head_kernel, scale=scale, s_real=S, tk=tk, n_kv=n_kv,
        mask_tail=mask_tail, bf16_exp=bf16_exp)

    # qi is the innermost grid axis, so the K/V block index (g, 0, h) is
    # unchanged across it -> K/V DMA'd from HBM once per (g, h) and kept resident.
    q_spec = pl.BlockSpec((1, tq, head_dim), lambda g, h, qi: (g, qi, h))
    kv_spec = pl.BlockSpec((1, sk_p, head_dim), lambda g, h, qi: (g, 0, h))
    o_spec = pl.BlockSpec((1, tq, head_dim), lambda g, h, qi: (g, qi, h))

    itemsize = q.dtype.itemsize
    est = (2 * 2 * sk_p * head_dim * itemsize      # resident K & V, double-buffered
           + 2 * 2 * tq * head_dim * itemsize      # q / o blocks, double-buffered
           + tq * head_dim * 4 + 2 * tq * 4        # f32 acc / m / l scratch
           + 2 * tq * tk * 4)                      # in-flight (tq, tk) score temps
    # TODO(synk): on v7x (64 MiB physical VMEM) keep this <= ~48 MiB by shrinking
    # the resident-KV window; 100 MiB cap assumes v5e/v6e's 128 MiB.
    vmem_limit = int(min(100 * 2**20, max(32 * 2**20, 2 * est)))

    out = pl.pallas_call(
        kernel,
        out_shape=jax.ShapeDtypeStruct((G, sq_p, Dm), q.dtype),
        grid_spec=pltpu.PrefetchScalarGridSpec(
            num_scalar_prefetch=0,
            grid=(G, num_head_blocks, n_q),        # no grid reduction axis
            in_specs=[q_spec, kv_spec, kv_spec],
            out_specs=o_spec,
            scratch_shapes=[
                pltpu.VMEM((tq, 1), jnp.float32),        # m (running max)
                pltpu.VMEM((tq, 1), jnp.float32),        # l (running denom)
                pltpu.VMEM((tq, head_dim), jnp.float32), # output accumulator
            ],
        ),
        compiler_params=pltpu.CompilerParams(
            dimension_semantics=("parallel", "parallel", "parallel"),
            vmem_limit_bytes=vmem_limit,
        ),
    )(qp, kp, vp)

    return out[:, :S, :] if sq_p != S else out


def multi_head_attention(x, params, num_heads, *, compute_dtype=None, tq=512, tk=512):
    """Full MHA forward. Projections are glue (plain JAX); attention core is Pallas."""
    B, S, D = x.shape
    assert D % num_heads == 0
    Dh = D // num_heads
    Wq, Wk, Wv, Wo = params["Wq"], params["Wk"], params["Wv"], params["Wo"]

    q, k, v = x @ Wq, x @ Wk, x @ Wv                                 # (B, S, D)
    if compute_dtype is not None:
        q, k, v = (t.astype(compute_dtype) for t in (q, k, v))

    if Dh % 128 == 0:
        # Lane-aligned heads: address head h as a 128-wide column block of the
        # (B, S, D) projections directly — no split/merge transpose HBM passes.
        o = mha_attention_core(q, k, v, num_head_blocks=num_heads, head_dim=Dh,
                               tq=tq, tk=tk)                         # (B, S, D)
    else:
        def split_heads(t):  # (B, S, D) -> (B*H, S, Dh)
            return t.reshape(B, S, num_heads, Dh).transpose(0, 2, 1, 3).reshape(
                B * num_heads, S, Dh)

        o = mha_attention_core(split_heads(q), split_heads(k), split_heads(v),
                               num_head_blocks=1, head_dim=Dh, tq=tq, tk=tk)
        o = o.reshape(B, num_heads, S, Dh).transpose(0, 2, 1, 3).reshape(B, S, D)

    return o.astype(x.dtype) @ Wo


def _reference_mha(x, params, num_heads):
    """Pure-JAX reference for correctness check."""
    B, S, D = x.shape
    Dh = D // num_heads
    Wq, Wk, Wv, Wo = params["Wq"], params["Wk"], params["Wv"], params["Wo"]
    q = (x @ Wq).reshape(B, S, num_heads, Dh).transpose(0, 2, 1, 3)
    k = (x @ Wk).reshape(B, S, num_heads, Dh).transpose(0, 2, 1, 3)
    v = (x @ Wv).reshape(B, S, num_heads, Dh).transpose(0, 2, 1, 3)
    s = jnp.einsum("bhqd,bhkd->bhqk", q, k) / math.sqrt(Dh)
    p = jax.nn.softmax(s, axis=-1)
    o = jnp.einsum("bhqk,bhkd->bhqd", p, v)
    o = o.transpose(0, 2, 1, 3).reshape(B, S, D)
    return o @ Wo


if __name__ == "__main__":
    # Make the f32 reference and the kernel path comparable (otherwise default-
    # precision TPU matmuls alone introduce ~5e-3 differences).
    jax.config.update("jax_default_matmul_precision", "highest")

    def check(B, S, D, H, *, compute_dtype=None, tq=512, tk=512, atol, rtol, tag):
        key = jax.random.PRNGKey(0)
        kx, kq, kk, kv_, ko = jax.random.split(key, 5)
        x = jax.random.normal(kx, (B, S, D), dtype=jnp.float32)
        wscale = 1.0 / math.sqrt(D)
        params = {
            "Wq": jax.random.normal(kq, (D, D), dtype=jnp.float32) * wscale,
            "Wk": jax.random.normal(kk, (D, D), dtype=jnp.float32) * wscale,
            "Wv": jax.random.normal(kv_, (D, D), dtype=jnp.float32) * wscale,
            "Wo": jax.random.normal(ko, (D, D), dtype=jnp.float32) * wscale,
        }
        out = multi_head_attention(x, params, H, compute_dtype=compute_dtype,
                                   tq=tq, tk=tk)
        out = jax.block_until_ready(out)
        ref = _reference_mha(x, params, H)
        assert out.shape == (B, S, D), f"{tag}: bad output shape {out.shape}"
        assert jnp.allclose(out, ref, atol=atol, rtol=rtol), f"{tag}: mismatch"

    # 1) Module-scale shapes (batch=2, seq=8, d_model=32, heads=4 -> Dh=8), f32.
    check(2, 8, 32, 4, atol=1e-3, rtol=1e-3, tag="small-f32")
    # 2) Dh=64 + ragged S: exercises the in-kernel kv loop and tail masking, f32.
    check(2, 80, 128, 2, tq=32, tk=32, atol=1e-3, rtol=1e-3, tag="ragged-f32")
    # 3) Lane-aligned heads (Dh=128, no-transpose path) with bf16 compute; loose
    #    tolerance is the expected bf16 rounding, not a kernel bug.
    check(2, 48, 256, 2, compute_dtype=jnp.bfloat16, tq=32, tk=32,
          atol=1e-1, rtol=1e-1, tag="aligned-bf16")

    print("KERNEL_OK")
</pallas_src>

<mosaic_0001>
module attributes {stable_mosaic.version = 11 : i64} {
  func.func @_flash_head_kernel(%arg0: i32, %arg1: i32, %arg2: i32, %arg3: memref<1x8x8xf32, #tpu.memory_space<vmem>>, %arg4: memref<1x8x8xf32, #tpu.memory_space<vmem>>, %arg5: memref<1x8x8xf32, #tpu.memory_space<vmem>>, %arg6: memref<1x8x8xf32, #tpu.memory_space<vmem>>, %arg7: memref<8x1xf32, #tpu.memory_space<vmem>>, %arg8: memref<8x1xf32, #tpu.memory_space<vmem>>, %arg9: memref<8x8xf32, #tpu.memory_space<vmem>>) attributes {dimension_semantics = [#tpu.dimension_semantics<parallel>, #tpu.dimension_semantics<parallel>, #tpu.dimension_semantics<parallel>], iteration_bounds = array<i64: 8, 1, 1>, scalar_prefetch = 0 : i64, scratch_operands = 3 : i64, tpu.core_type = #tpu.core_type<tc>, window_params = [{transform_indices = @transform_0, window_bounds = array<i64: 1, 8, 8>}, {transform_indices = @transform_1, window_bounds = array<i64: 1, 8, 8>}, {transform_indices = @transform_2, window_bounds = array<i64: 1, 8, 8>}, {transform_indices = @transform_3, window_bounds = array<i64: 1, 8, 8>}]} {
    %cst = arith.constant -1.000000e+30 : f32
    %0 = vector.broadcast %cst : f32 to vector<8x1xf32>
    %c0 = arith.constant 0 : index
    %c0_0 = arith.constant 0 : index
    %1 = vector.load %arg7[%c0, %c0_0] : memref<8x1xf32, #tpu.memory_space<vmem>>, vector<8x1xf32>
    tpu.vector_store %arg7[%c0, %c0_0], %0 {strides = array<i32>} : memref<8x1xf32, #tpu.memory_space<vmem>>, vector<8x1xf32>,
    %cst_1 = arith.constant 0.000000e+00 : f32
    %2 = vector.broadcast %cst_1 : f32 to vector<8x1xf32>
    %c0_2 = arith.constant 0 : index
    %c0_3 = arith.constant 0 : index
    %3 = vector.load %arg8[%c0_2, %c0_3] : memref<8x1xf32, #tpu.memory_space<vmem>>, vector<8x1xf32>
    tpu.vector_store %arg8[%c0_2, %c0_3], %2 {strides = array<i32>} : memref<8x1xf32, #tpu.memory_space<vmem>>, vector<8x1xf32>,
    %cst_4 = arith.constant 0.000000e+00 : f32
    %4 = vector.broadcast %cst_4 : f32 to vector<8x8xf32>
    %c0_5 = arith.constant 0 : index
    %c0_6 = arith.constant 0 : index
    %5 = vector.load %arg9[%c0_5, %c0_6] : memref<8x8xf32, #tpu.memory_space<vmem>>, vector<8x8xf32>
    tpu.vector_store %arg9[%c0_5, %c0_6], %4 {strides = array<i32>} : memref<8x8xf32, #tpu.memory_space<vmem>>, vector<8x8xf32>,
    %c0_7 = arith.constant 0 : index
    %c0_8 = arith.constant 0 : index
    %c0_9 = arith.constant 0 : index
    %6 = vector.load %arg3[%c0_7, %c0_8, %c0_9] : memref<1x8x8xf32, #tpu.memory_space<vmem>>, vector<1x8x8xf32>
    %7 = vector.shape_cast %6 : vector<1x8x8xf32> to vector<8x8xf32>
    %cst_10 = arith.constant 0.353553385 : f32
    %8 = vector.broadcast %cst_10 : f32 to vector<8x8xf32>
    %9 = arith.mulf %7, %8 : vector<8x8xf32>
    %c0_i32 = arith.constant 0 : i32
    %c1_i32 = arith.constant 1 : i32
    %10 = arith.muli %c0_i32, %c1_i32 : i32
    %c0_i32_11 = arith.constant 0 : i32
    %11 = arith.addi %c0_i32_11, %10 : i32
    %c8_i32 = arith.constant 8 : i32
    %12 = arith.muli %11, %c8_i32 : i32
    %13 = tpu.assume_multiple %12, 8 : i32
    %c0_12 = arith.constant 0 : index
    %14 = arith.index_cast %13 : i32 to index
    %c0_13 = arith.constant 0 : index
    %15 = vector.load %arg4[%c0_12, %14, %c0_13] : memref<1x8x8xf32, #tpu.memory_space<vmem>>, vector<1x8x8xf32>
    %16 = vector.shape_cast %15 : vector<1x8x8xf32> to vector<8x8xf32>
    %c0_14 = arith.constant 0 : index
    %17 = arith.index_cast %13 : i32 to index
    %c0_15 = arith.constant 0 : index
    %18 = vector.load %arg5[%c0_14, %17, %c0_15] : memref<1x8x8xf32, #tpu.memory_space<vmem>>, vector<1x8x8xf32>
    %19 = vector.shape_cast %18 : vector<1x8x8xf32> to vector<8x8xf32>
    %cst_16 = arith.constant dense<0.000000e+00> : vector<8x8xf32>
    %20 = tpu.matmul %9, %16, %cst_16 {dimension_numbers = #tpu.dot_dimension_numbers<[1], [1], [0], [0], [0, 0, 1, 0], [], []>, precision = #tpu.contract_precision<fp32>} : vector<8x8xf32>, vector<8x8xf32>, vector<8x8xf32> -> vector<8x8xf32>
    %c0_17 = arith.constant 0 : index
    %c0_18 = arith.constant 0 : index
    %21 = vector.load %arg7[%c0_17, %c0_18] : memref<8x1xf32, #tpu.memory_space<vmem>>, vector<8x1xf32>
    %cst_19 = arith.constant dense<0xFF800000> : vector<8xf32>
    %22 = vector.multi_reduction <maximumf>, %20, %cst_19 [1] : vector<8x8xf32> to vector<8xf32>
    %23 = vector.shape_cast %22 : vector<8xf32> to vector<8x1xf32>
    %24 = arith.maximumf %21, %23 : vector<8x1xf32>
    %25 = arith.subf %21, %24 : vector<8x1xf32>
    %26 = math.exp %25 : vector<8x1xf32>
    %27 = vector.broadcast %24 : vector<8x1xf32> to vector<8x8xf32>
    %28 = arith.subf %20, %27 : vector<8x8xf32>
    %29 = math.exp %28 : vector<8x8xf32>
    %c0_20 = arith.constant 0 : index
    %c0_21 = arith.constant 0 : index
    %30 = vector.load %arg8[%c0_20, %c0_21] : memref<8x1xf32, #tpu.memory_space<vmem>>, vector<8x1xf32>
    %31 = arith.mulf %26, %30 : vector<8x1xf32>
    %cst_22 = arith.constant dense<0.000000e+00> : vector<8xf32>
    %32 = vector.multi_reduction <add>, %29, %cst_22 [1] : vector<8x8xf32> to vector<8xf32>
    %33 = vector.shape_cast %32 : vector<8xf32> to vector<8x1xf32>
    %34 = arith.addf %31, %33 : vector<8x1xf32>
    %c0_23 = arith.constant 0 : index
    %c0_24 = arith.constant 0 : index
    %35 = vector.load %arg8[%c0_23, %c0_24] : memref<8x1xf32, #tpu.memory_space<vmem>>, vector<8x1xf32>
    tpu.vector_store %arg8[%c0_23, %c0_24], %34 {strides = array<i32>} : memref<8x1xf32, #tpu.memory_space<vmem>>, vector<8x1xf32>,
    %c0_25 = arith.constant 0 : index
    %c0_26 = arith.constant 0 : index
    %36 = vector.load %arg9[%c0_25, %c0_26] : memref<8x8xf32, #tpu.memory_space<vmem>>, vector<8x8xf32>
    %37 = vector.broadcast %26 : vector<8x1xf32> to vector<8x8xf32>
    %38 = arith.mulf %37, %36 : vector<8x8xf32>
    %cst_27 = arith.constant dense<0.000000e+00> : vector<8x8xf32>
    %39 = tpu.matmul %29, %19, %cst_27 {dimension_numbers = #tpu.dot_dimension_numbers<[1], [0], [0], [1], [0, 0, 1, 1], [], []>, precision = #tpu.contract_precision<fp32>} : vector<8x8xf32>, vector<8x8xf32>, vector<8x8xf32> -> vector<8x8xf32>
    %40 = arith.addf %38, %39 : vector<8x8xf32>
    %c0_28 = arith.constant 0 : index
    %c0_29 = arith.constant 0 : index
    %41 = vector.load %arg9[%c0_28, %c0_29] : memref<8x8xf32, #tpu.memory_space<vmem>>, vector<8x8xf32>
    tpu.vector_store %arg9[%c0_28, %c0_29], %40 {strides = array<i32>} : memref<8x8xf32, #tpu.memory_space<vmem>>, vector<8x8xf32>,
    %c0_30 = arith.constant 0 : index
    %c0_31 = arith.constant 0 : index
    %42 = vector.load %arg7[%c0_30, %c0_31] : memref<8x1xf32, #tpu.memory_space<vmem>>, vector<8x1xf32>
    tpu.vector_store %arg7[%c0_30, %c0_31], %24 {strides = array<i32>} : memref<8x1xf32, #tpu.memory_space<vmem>>, vector<8x1xf32>,
    %c1_i32_32 = arith.constant 1 : i32
    %c0_33 = arith.constant 0 : index
    %c0_34 = arith.constant 0 : index
    %43 = vector.load %arg9[%c0_33, %c0_34] : memref<8x8xf32, #tpu.memory_space<vmem>>, vector<8x8xf32>
    %c0_35 = arith.constant 0 : index
    %c0_36 = arith.constant 0 : index
    %44 = vector.load %arg8[%c0_35, %c0_36] : memref<8x1xf32, #tpu.memory_space<vmem>>, vector<8x1xf32>
    %45 = vector.broadcast %44 : vector<8x1xf32> to vector<8x8xf32>
    %46 = arith.divf %43, %45 : vector<8x8xf32>
    %c0_37 = arith.constant 0 : index
    %c0_38 = arith.constant 0 : index
    %c0_39 = arith.constant 0 : index
    %47 = vector.load %arg6[%c0_37, %c0_38, %c0_39] : memref<1x8x8xf32, #tpu.memory_space<vmem>>, vector<1x8x8xf32>
    %48 = vector.shape_cast %47 : vector<1x8x8xf32> to vector<8x8xf32>
    %49 = vector.shape_cast %46 : vector<8x8xf32> to vector<1x8x8xf32>
    tpu.vector_store %arg6[%c0_37, %c0_38, %c0_39], %49 {strides = array<i32>} : memref<1x8x8xf32, #tpu.memory_space<vmem>>, vector<1x8x8xf32>,
    return
  }
  func.func @transform_0(%arg0: i32, %arg1: i32, %arg2: i32) -> (i32, i32, i32) {
    %c0_i32 = arith.constant 0 : i32
    return %arg0, %arg2, %arg1 : i32, i32, i32
  }
  func.func @transform_1(%arg0: i32, %arg1: i32, %arg2: i32) -> (i32, i32, i32) {
    %c0_i32 = arith.constant 0 : i32
    %c0_i32_0 = arith.constant 0 : i32
    return %arg0, %c0_i32, %arg1 : i32, i32, i32
  }
  func.func @transform_2(%arg0: i32, %arg1: i32, %arg2: i32) -> (i32, i32, i32) {
    %c0_i32 = arith.constant 0 : i32
    %c0_i32_0 = arith.constant 0 : i32
    return %arg0, %c0_i32, %arg1 : i32, i32, i32
  }
  func.func @transform_3(%arg0: i32, %arg1: i32, %arg2: i32) -> (i32, i32, i32) {
    %c0_i32 = arith.constant 0 : i32
    return %arg0, %arg2, %arg1 : i32, i32, i32
  }
}

</mosaic_0001>

<bundles_post_ra>
// kernel: tpu_custom_call.1
= control target key start
LH: loop header
LB: loop body
LE: loop exit
PB: predicated region body
PF: predicated region fallthrough
CT: control target
= control target key end

     0   :  { %s2022_s0 = inlined_call_operand.hbm [shape: f32[8,8,8], index: 0, kind: input, shape index: {}]   ;;  %s2023_s1 = inlined_call_operand.hbm [shape: f32[8,8,8], index: 1, kind: input, shape index: {}]   ;;  %s2024_s2 = inlined_call_operand.hbm [shape: f32[8,8,8], index: 2, kind: input, shape index: {}]   ;;  %s2025_s3 = inlined_call_operand.hbm [shape: f32[8,8,8], index: 3, kind: output, shape index: {}]  }
   0x1   :  { %2029 = sst [smem:[#allocation17_spill]] %s2023_s1 }
   0x2   :  { %8 = vsyncpa [#allocation6], 0 }
   0x3   :  { %10 = vsyncpa [#allocation6 + $0x1], 0 }
   0x4   :  { %11 = vsyncpa [#allocation9], 0 }
   0x5   :  { %13 = vsyncpa [#allocation9 + $0x1], 0 }
   0x6   :  { %14 = vsyncpa [#allocation7], 0 }
   0x7   :  { %16 = vsyncpa [#allocation7 + $0x1], 0  ;;  %s1776_s12 = smov 0   ;;  %s1778_s13 = smov 0  }
   0x8   :  { %s1780_s14 = smov 0   ;;  %s1782_s15 = smov 0  }
   0x9   :  { %s1784_s16 = smov 0   ;;  %s1786_s17 = smov 0  }
   0xa LB: > { %2030 = sst [smem:[#allocation15_spill]] %s1742_s16  ;;  %s1807_s18 = sadd.s32 4294967295, %s1746_s17   ;;  %s1746_s17 = sphi %s1786_s17, %s22_s17   ;;  %s1742_s16 = sphi %s1784_s16, %s2041_s16   ;;  %s1738_s15 = sphi %s1782_s15, %s2040_s15   ;;  %s1734_s14 = sphi %s1780_s14, %s2044_s14   ;;  %s1730_s13 = sphi %s1778_s13, %s2043_s13   ;;  %s1726_s12 = sphi %s1776_s12, %s2042_s12  }
   0xb   : > { %s1392_s19 = sadd.s32 4294967294, %s1746_s17   ;;  %s41_s20 = sadd.s32 1, %s1742_s16 }
   0xc   : > { %s52_s21 = sadd.s32 1, %s1734_s14  ;;  %p43_p0 = scmp.ge.s32.totalorder %s41_s20, 8 }
   0xd   : > { %p59_p1 = scmp.ne.s32.totalorder %s1734_s14, %s1730_s13  ;;  %p60_p2 = scmp.eq.s32.totalorder %s1746_s17, 0 }
   0xe   : > { %p65_p3 = scmp.ne.s32.totalorder %s1730_s13, %s1726_s12  ;;  %s2046_s20 = smov (%p43_p0, %s41_s20), 0 }
   0xf   : > { %2031 = sst [smem:[#allocation16_spill]] %s2046_s20  ;;  %p1819_p4 = por %p60_p2, %p59_p1 }
  0x10   : > { %p66_p5 = scmp.eq.s32.totalorder %s1807_s18, 0  ;;  %s45_s23 = ssub.s32 %s1742_s16, %s2046_s20 }
  0x11   : > { %p149_p6 = scmp.eq.s32.totalorder %s1807_s18, 7  ;;  %p50_p7 = scmp.eq.s32.totalorder %s45_s23, 0 }
  0x12   : > { %p1827_p8 = por %p66_p5, %p65_p3  ;;  %p155_p10 = scmp.eq.s32.totalorder %s1392_s19, 7 }
  0x13   : > { %p1831_p9 = por %p149_p6, %p59_p1  ;;  %p1516_p12 = scmp.lt.s32.totalorder %s1746_s17, 8 }
  0x14   : > { %s1836_s26 = scalar_select %p50_p7, %s1734_s14, %s52_s21  }
  0x15   : > { %p1838_p11 = por %p155_p10, %p65_p3  ;;  %s2026_s28 = sand.u32 1, %s1734_s14  }
  0x16   : > { %s1846_s29 = sshll.u32 %s2026_s28, 3  ;;  %s1849_s30 = sshll.u32 %s1742_s16, 7 }
  0x17   : > { %p1853_p13 = pnand %p1516_p12, %p1819_p4  ;;  %s195_s5 = sand.u32 1, %s1746_s17  }
  0x18   : > { %s2037_s1 = sld [smem:[#allocation17_spill]]  ;;  %s199_s9 = scalar_lea.vmem [#allocation8], %s1846_s29 }
  0x19   : > { %s207_s10 = sshll.u32 %s199_s9, 4  ;;  %p1401_p0 = scmp.ge.s32.totalorder %s1746_s17, 1  ;;  %s208_s10 = int_to_ptr.vmem [resolvable:$true] %s207_s10 }
  0x1a   : > { %p231_p1 = scmp.lt.s32.totalorder %s1746_s17, 9  ;;  %s1865_s11 = scalar_lea.sflag [#allocation9], %s195_s5 }
  0x1b   : > { %p1580_p2 = pneg %p1853_p13  ;;  %s1591_s19 = scalar_lea.vmem %s208_s10, 128 }
  0x1c   : > { %p1592_p3 = scmp.ne.s32.totalorder %s208_s10, %s1591_s19  ;;  %s1748_s21 = smov [#allocation8]  }
  0x1d   : > { %s1596_s22 = sshll.u32 %s1748_s21, 4  ;;  %s1597_s22 = int_to_ptr.vmem [resolvable:$false] %s1596_s22 }
  0x1e   : > { %s205_s8 = scalar_lea.hbm %s2037_s1, %s1849_s30  ;;  %p1594_p4 = pnand %p1592_p3, %p1580_p2 }
  0x1f   : > { %s1598_s23 = scalar_lea.vmem %s1597_s22, 256  ;;  %p1599_p6 = scmp.lt.s32.totalorder %s208_s10, %s1597_s22 }
  0x20   : > { %p1595_p5 = pneg %p1594_p4  ;;  %p1600_p7 = scmp.lt.s32.totalorder %s1598_s23, %s1591_s19 }
  0x22   : > { %p1601_p10 = por %p1600_p7, %p1599_p6 }
  0x24   : > { %p1602_p12 = pnand %p1601_p10, %p1595_p5 }
  0x26   : > { %1605 = shalt.err (!%p1602_p12)
}
  0x27   : > { %1508 = dma.hbm_to_vmem [thread:$0]  (!%p1853_p13), %s205_s8, 128, %s208_s10, %s1865_s11  }
  0x28   : > { %p1879_p3 = pnand %p1401_p0, %p231_p1  ;;  %s186_s9 = scalar_lea.hbm %s2022_s0, %s1849_s30 }
  0x29   : > { %s179_s19 = scalar_lea.vmem [#allocation5], %s1846_s29  ;;  %s224_s28 = scalar_lea.hbm %s2024_s2, %s1849_s30 }
  0x2a   : > { %s188_s21 = sshll.u32 %s179_s19, 4  ;;  %s2039_s1 = sand.u32 1, %s1734_s14   ;;  %s189_s21 = int_to_ptr.vmem [resolvable:$true] %s188_s21 }
  0x2b   : > { %s176_s20 = scalar_lea.sflag [#allocation6], %s2039_s1  ;;  %s1619_s8 = scalar_lea.vmem %s189_s21, 128 }
  0x2c   : > { %p1620_p4 = scmp.ne.s32.totalorder %s189_s21, %s1619_s8  ;;  %s1749_s10 = smov [#allocation5]  }
  0x2d   : > { %s1624_s16 = sshll.u32 %s1749_s10, 4  ;;  %s1625_s16 = int_to_ptr.vmem [resolvable:$false] %s1624_s16 }
  0x2e   : > { %p1622_p0 = pnand %p1620_p4, %p1580_p2  ;;  %s1626_s6 = scalar_lea.vmem %s1625_s16, 256 }
  0x2f   : > { %p1627_p5 = scmp.lt.s32.totalorder %s189_s21, %s1625_s16  ;;  %p1628_p6 = scmp.lt.s32.totalorder %s1626_s6, %s1619_s8 }
  0x30   : > { %p1623_p1 = pneg %p1622_p0 }
  0x31   : > { %p1629_p7 = por %p1628_p6, %p1627_p5 }
  0x33   : > { %p1630_p10 = pnand %p1629_p7, %p1623_p1 }
  0x35   : > { %1633 = shalt.err (!%p1630_p10)
}
  0x36   : > { %1505 = dma.hbm_to_vmem [thread:$0]  (!%p1853_p13), %s186_s9, 128, %s189_s21, %s176_s20  }
  0x37   : > { %s218_s1 = scalar_lea.vmem [#allocation10], %s1846_s29  ;;  %s1750_s22 = smov [#allocation10]  }
  0x38   : > { %s226_s7 = sshll.u32 %s218_s1, 4  ;;  %s1652_s16 = sshll.u32 %s1750_s22, 4  ;;  %s227_s7 = int_to_ptr.vmem [resolvable:$true] %s226_s7  ;;  %s1653_s16 = int_to_ptr.vmem [resolvable:$false] %s1652_s16 }
  0x39   : > { %s1647_s19 = scalar_lea.vmem %s227_s7, 128  ;;  %s1654_s23 = scalar_lea.vmem %s1653_s16, 256 }
  0x3a   : > { %p1648_p12 = scmp.ne.s32.totalorder %s227_s7, %s1647_s19  ;;  %p1655_p1 = scmp.lt.s32.totalorder %s227_s7, %s1653_s16 }
  0x3b   : > { %p1656_p5 = scmp.lt.s32.totalorder %s1654_s23, %s1647_s19 }
  0x3c   : > { %p1650_p4 = pnand %p1648_p12, %p1580_p2 }
  0x3d   : > { %p1657_p6 = por %p1656_p5, %p1655_p1 }
  0x3e   : > { %p1651_p0 = pneg %p1650_p4 }
  0x40   : > { %p1658_p7 = pnand %p1657_p6, %p1651_p0 }
  0x42   : > { %1661 = shalt.err (!%p1658_p7)
}
  0x43   : > { %1511 = dma.hbm_to_vmem [thread:$0]  (!%p1853_p13), %s224_s28, 128, %s227_s7, %s1865_s11  }
  0x44   : > { %235 = sbr.rel (%p1879_p3) target bundleno = 883 (0x373), region = 32  ;;  %s1914_s9 = sand.u32 (!%p1879_p3), 1, %s1730_s13  }
  0x45   : > { %s1917_s21 = sshll.u32 (!%p1879_p3), %s1914_s9, 3  ;;  %s238_s4 = scalar_lea.sflag (!%p1879_p3), [#allocation6], %s1914_s9 }
  0x46   : > { %s241_s8 = scalar_lea.vmem (!%p1879_p3), [#allocation5], %s1917_s21 }
  0x49   : > { %1713 = dma.done.wait (%p1827_p8), %s238_s4, 128  }
  0x4a   : > { %1715 = vsyncadd (%p1827_p8), %s238_s4, 4294967168  ;;  %s246_s28 = sand.u32 1, %s1807_s18   ;;  %s250_s11 = scalar_lea.vmem [#allocation8], %s1917_s21 }
  0x4b   : > { %s247_s30 = scalar_lea.sflag [#allocation9], %s246_s28 }
  0x4c   : > { %1717 = dma.done.wait (%p1827_p8), %s247_s30, 256  }
  0x4d   : > { %1719 = vsyncadd (%p1827_p8), %s247_s30, 4294967040  ;;  %vm295_vm0 = vcmask 64512   ;;  %v1751_v0 = vmov 0.0   ;;  %vm1752_vm1 = vmmov 0   ;;  %v299_v1 = vld [vmem:[%s250_s11] sm:$0xff]  ;;  %v297_v2 = vld [vmem:[%s241_s8] sm:$0xff] }
  0x4e   : > { %1434 = vmatprep.subr.mxu0 %v1751_v0  ;;  %296 = vst.msk [vmem:[#allocation4] sm:$0xff] %vm295_vm0, %v1751_v0  ;;  %1439 = vmatprep.subr.mxu1 %v1751_v0  ;;  %v305_v3 = vsel %vm295_vm0, %v299_v1, 0  ;;  %v298_v4 = vmul.f32 0.35355338, %v297_v2  ;;  %vm292_vm2 = vcmask 7168   ;;  %v1754_v35 = vmov 0  }
  0x4f   : > { %1436 = vmatprep.mubr.msk.f32.mxu0 %vm1752_vm1, %v1751_v0  ;;  %1441 = vmatprep.mubr.msk.f32.mxu1 %vm1752_vm1, %v1751_v0  ;;  %v338_v5 = vand.u32 4294901760, %v305_v3  ;;  %v1753_v16 = vmov -1e+30   ;;  %294 = vst.msk [vmem:[#allocation3] sm:$0xff] %vm292_vm2, %v1751_v0  ;;  %s259_s18 = scalar_lea.vmem [#allocation10], %s1917_s21  ;;  %s1407_s24 = sshll.u32 %s1738_s15, 7 }
  0x50   : > { %v302_v6 = vsel %vm295_vm0, %v298_v4, 0  ;;  %293 = vst.msk [vmem:[#allocation2] sm:$0xff] %vm292_vm2, %v1753_v16  ;;  %1570 = vset.pattern.permute.xlu0 %v1754_v35  ;;  %1571 = vset.pattern.permute.xlu1 %v1754_v35  ;;  %v300_v40 = vld [vmem:[%s259_s18] sm:$0xff]  ;;  %s291_s5 = scalar_lea.vmem [#allocation11], %s1917_s21  ;;  %s1259_s7 = scalar_lea.hbm %s2025_s3, %s1407_s24 }
  0x51   : > { %1435 = vmatpush3.xpose.msra.mxu0 %v338_v5  ;;  %v415_v7 = vsub.f32 %v305_v3, %v338_v5  ;;  %v373_v8 = vand.u32 4294901760, %v302_v6  ;;  %v817_v41 = vand.u32 4294901760, %v300_v40  ;;  %s1261_s10 = sshll.u32 %s291_s5, 4  ;;  %s1246_s19 = scalar_lea.sflag [#allocation7], %s1914_s9  ;;  %s1262_s10 = int_to_ptr.vmem [resolvable:$true] %s1261_s10 }
  0x52   : > { %1444 = vmatprep.subr.mxu0 %v1751_v0  ;;  %s1662_s22 = scalar_lea.vmem %s1262_s10, 128  ;;  %s1755_s16 = smov [#allocation11]  }
  0x53   : > { %v416_v9 = vand.u32 4294901760, %v415_v7  ;;  %v374_v10 = vsub.f32 %v302_v6, %v373_v8  ;;  %v894_v42 = vsub.f32 %v300_v40, %v817_v41  ;;  %p1663_p8 = scmp.ne.s32.totalorder %s1262_s10, %s1662_s22  ;;  %s1666_s15 = sshll.u32 %s1755_s16, 4  ;;  %s1667_s15 = int_to_ptr.vmem [resolvable:$false] %s1666_s15 }
  0x54   : > { %s1668_s23 = scalar_lea.vmem %s1667_s15, 256  ;;  %p1669_p3 = scmp.lt.s32.totalorder %s1262_s10, %s1667_s15 }
  0x55   : > { %v417_v11 = vsub.f32 %v415_v7, %v416_v9  ;;  %v375_v12 = vand.u32 4294901760, %v374_v10  ;;  %v895_v43 = vand.u32 4294901760, %v894_v42  ;;  %p1664_p13 = pnand %p1663_p8, %p1831_p9  ;;  %p1670_p10 = scmp.lt.s32.totalorder %s1668_s23, %s1662_s22 }
  0x56   : > { %v769_v59 = vld [vmem:[#allocation3] sm:$0xff] }
  0x57   : > { %v418_v13 = vand.u32 4294901760, %v417_v11  ;;  %v376_v14 = vsub.f32 %v374_v10, %v375_v12  ;;  %v753_v36 = vld [vmem:[#allocation2] sm:$0xff]  ;;  %v896_v44 = vsub.f32 %v894_v42, %v895_v43  ;;  %p1665_p2 = pneg %p1664_p13  ;;  %p1671_p12 = por %p1670_p10, %p1669_p3 }
  0x59   : > { %1440 = vmatpush3.xpose.msra.mxu1 %v418_v13  ;;  %v377_v15 = vand.u32 4294901760, %v376_v14  ;;  %v897_v45 = vand.u32 4294901760, %v896_v44  ;;  %p1672_p4 = pnand %p1671_p12, %p1665_p2 }
  0x5a   : > { %1449 = vmatprep.subr.mxu1 %v1751_v0 }
  0x5b   : > { %1437 = vmatmul.mubr.f32.vlgmr.msra.gmra.mxu0 %v377_v15 }
  0x5c   : > { %1445 = vmatpush3.xpose.msra.mxu0 %v415_v7  ;;  %1442 = vmatmul.mubr.f32.vlgmr.msra.gmra.mxu1 %v373_v8 }
  0x5d   : > { %1450 = vmatpush3.xpose.msra.mxu1 %v338_v5  ;;  %1446 = vmatprep.mubr.msk.f32.mxu0 %vm1752_vm1, %v1751_v0 }
  0x5e   : > { %1454 = vmatprep.subr.mxu0 %v1751_v0  ;;  %1451 = vmatprep.mubr.msk.f32.mxu1 %vm1752_vm1, %v1751_v0 }
  0x5f   : > { %1447 = vmatmul.mubr.f32.vlgmr.msra.gmra.mxu0 %v374_v10  ;;  %1459 = vmatprep.subr.mxu1 %v1751_v0 }
  0x60   : > { %1455 = vmatpush3.xpose.msra.mxu0 %v416_v9  ;;  %1452 = vmatmul.mubr.f32.vlgmr.msra.gmra.mxu1 %v375_v12 }
  0x61   : > { %1460 = vmatpush3.xpose.msra.mxu1 %v338_v5  ;;  %1456 = vmatprep.mubr.msk.f32.mxu0 %vm1752_vm1, %v1751_v0 }
  0x62   : > { %1461 = vmatprep.mubr.msk.f32.mxu1 %vm1752_vm1, %v1751_v0  ;;  %1469 = vmatprep.subr.mxu1 %v1751_v0 }
  0x63   : > { %1457 = vmatmul.mubr.f32.vlgmr.msra.gmra.mxu0 %v373_v8  ;;  %1464 = vmatprep.subr.mxu0 %v1751_v0 }
  0x64   : > { %1462 = vmatmul.mubr.f32.vlgmr.msra.gmra.mxu1 %v373_v8  ;;  %1466 = vmatprep.mubr.msk.f32.mxu0 %vm1752_vm1, %v1751_v0 }
  0x65   : > { %1471 = vmatprep.mubr.msk.f32.mxu1 %vm1752_vm1, %v1751_v0  ;;  %1465 = vmatpush3.msra.mxu0 %v817_v41 }
  0x66   : > { %1474 = vmatprep.subr.mxu0 %v1751_v0  ;;  %1470 = vmatpush3.msra.mxu1 %v897_v45 }
  0x67   : > { %1479 = vmatprep.subr.mxu1 %v1751_v0 }
 0x11b   : > { %v379_v17 = vpop.f32.mrf.mxu0 }
 0x11c   : > { %v455_v18 = vpop.f32.mrf.mxu1 }
 0x11d   : > { %v456_v19 = vadd.f32 %v455_v18, %v379_v17  ;;  %v1438_v20 = vpop.f32.mrf.mxu0  ;;  %v776_v18 = vld [vmem:[#allocation4] sm:$0xff] }
 0x11e   : > { %v1443_v21 = vpop.f32.mrf.mxu1 }
 0x11f   : > { %v529_v22 = vpop.f32.mrf.mxu0 }
 0x120   : > { %v530_v23 = vadd.f32 %v529_v22, %v456_v19  ;;  %v603_v24 = vpop.f32.mrf.mxu1 }
 0x121   : > { %v1448_v25 = vpop.f32.mrf.mxu0 }
 0x122   : > { %v604_v26 = vadd.f32 %v603_v24, %v530_v23  ;;  %v1453_v27 = vpop.f32.mrf.mxu1 }
 0x123   : > { %v677_v28 = vpop.f32.mrf.mxu0 }
 0x124   : > { %v678_v29 = vadd.f32 %v677_v28, %v604_v26  ;;  %v749_v30 = vpop.f32.mrf.mxu1 }
 0x125   : > { %v1458_v31 = vpop.f32.mrf.mxu0 }
 0x126   : > { %v750_v32 = vadd.f32 %v749_v30, %v678_v29  ;;  %v1463_v33 = vpop.f32.mrf.mxu1 }
 0x128   : > { %v754_v34 = vsel %vm295_vm0, %v750_v32, -inf }
 0x129   : > { %755 = vmax.xlane.f32.xlu0 %v754_v34 }
 0x1b2   : > { %v756_v37 = vpop.xlane.xlu0 %755 }
 0x1b3   : > { %v757_v38 = vmax.f32 %v753_v36, %v756_v37 }
 0x1b5   : > { %v758_v39 = vsub.f32 %v753_v36, %v757_v38  ;;  %1234 = vst.msk [vmem:[#allocation2] sm:$0xff] %vm292_vm2, %v757_v38  ;;  %763 = vperm.xlu0 %1570, %v757_v38  }
 0x1b7   : > { %v759_v57 = vmul.f32 1.442695, %v758_v39 }
 0x230   : > { %v764_v46 = vpop.permute.xlu0 %763 }
 0x231   : > { %v766_v47 = vsub.f32 %v750_v32, %v764_v46 }
 0x233   : > { %v767_v48 = vmul.f32 1.442695, %v766_v47 }
 0x235   : > { %1572 = vpow2.f32 %v767_v48 }
 0x236   : > { %1574 = vpow2.f32 %v759_v57 }
 0x242   : > { %v1573_v49 = vpop.eup %1572 }
 0x243   : > { %v771_v50 = vsel %vm295_vm0, %v1573_v49, 0.0  ;;  %v784_v51 = vsel %vm295_vm0, %v1573_v49, 0  ;;  %v1575_v58 = vpop.eup %1574 }
 0x244   : > { %772 = vadd.xlane.f32.xlu1 %v771_v50  ;;  %v852_v52 = vand.u32 4294901760, %v784_v51  ;;  %v770_v60 = vmul.f32 %v1575_v58, %v769_v59 }
 0x246   : > { %v853_v53 = vsub.f32 %v784_v51, %v852_v52  ;;  %1472 = vmatmul.mubr.f32.vlgmr.msra.gmra.mxu1 %v852_v52 }
 0x247   : > { %1480 = vmatpush3.msra.mxu1 %v817_v41  ;;  %1481 = vmatprep.mubr.msk.f32.mxu1 %vm1752_vm1, %v1751_v0 }
 0x248   : > { %v854_v54 = vand.u32 4294901760, %v853_v53  ;;  %1489 = vmatprep.subr.mxu1 %v1751_v0 }
 0x24a   : > { %1482 = vmatmul.mubr.f32.vlgmr.msra.gmra.mxu1 %v854_v54  ;;  %v855_v55 = vsub.f32 %v853_v53, %v854_v54 }
 0x24b   : > { %1490 = vmatpush3.msra.mxu1 %v817_v41  ;;  %1491 = vmatprep.mubr.msk.f32.mxu1 %vm1752_vm1, %v1751_v0 }
 0x24c   : > { %v856_v56 = vand.u32 4294901760, %v855_v55 }
 0x24e   : > { %1467 = vmatmul.mubr.f32.vlgmr.msra.gmra.mxu0 %v856_v56  ;;  %1492 = vmatmul.mubr.f32.vlgmr.msra.gmra.mxu1 %v852_v52 }
 0x24f   : > { %1475 = vmatpush3.msra.mxu0 %v894_v42  ;;  %1476 = vmatprep.mubr.msk.f32.mxu0 %vm1752_vm1, %v1751_v0 }
 0x250   : > { %1484 = vmatprep.subr.mxu0 %v1751_v0 }
 0x252   : > { %1477 = vmatmul.mubr.f32.vlgmr.msra.gmra.mxu0 %v853_v53 }
 0x253   : > { %1485 = vmatpush3.msra.mxu0 %v895_v43  ;;  %1486 = vmatprep.mubr.msk.f32.mxu0 %vm1752_vm1, %v1751_v0 }
 0x256   : > { %1487 = vmatmul.mubr.f32.vlgmr.msra.gmra.mxu0 %v852_v52 }
 0x2cd   : > { %v773_v61 = vpop.xlane.xlu1 %772 }
 0x2ce   : > { %v774_v62 = vadd.f32 %v773_v61, %v770_v60 }
 0x2d0   : > { %775 = vst.msk [vmem:[#allocation3] sm:$0xff] %vm292_vm2, %v774_v62 }
 0x2d7   : > { %v1236_v63 = vld [vmem:[#allocation3] sm:$0xff] }
 0x2d8   : > { %1239 = vperm.xlu1 %1571, %v1236_v63  }
 0x2dc   : > { %779 = vperm.xlu1 %1571, %v1575_v58  }
 0x306   : > { %v934_v1 = vpop.f32.mrf.mxu1 }
 0x308   : > { %v1473_v2 = vpop.f32.mrf.mxu1 }
 0x30a   : > { %v1082_v3 = vpop.f32.mrf.mxu1 }
 0x30c   : > { %v1483_v4 = vpop.f32.mrf.mxu1 }
 0x30e   : > { %v858_v5 = vpop.f32.mrf.mxu0  ;;  %v1228_v6 = vpop.f32.mrf.mxu1 }
 0x30f   : > { %v935_v0 = vadd.f32 %v934_v1, %v858_v5 }
 0x310   : > { %v1468_v7 = vpop.f32.mrf.mxu0  ;;  %v1493_v8 = vpop.f32.mrf.mxu1 }
 0x312   : > { %v1008_v9 = vpop.f32.mrf.mxu0 }
 0x313   : > { %v1009_v10 = vadd.f32 %v1008_v9, %v935_v0 }
 0x314   : > { %v1478_v11 = vpop.f32.mrf.mxu0 }
 0x315   : > { %v1083_v12 = vadd.f32 %v1082_v3, %v1009_v10 }
 0x316   : > { %v1156_v13 = vpop.f32.mrf.mxu0 }
 0x317   : > { %v1157_v14 = vadd.f32 %v1156_v13, %v1083_v12 }
 0x318   : > { %v1488_v15 = vpop.f32.mrf.mxu0 }
 0x319   : > { %v1229_v16 = vadd.f32 %v1228_v6, %v1157_v14 }
 0x353   : > { %v1240_v17 = vpop.permute.xlu1 %1239 }
 0x354   : > { %1576 = vrcp.f32 %v1240_v17 }
 0x357   : > { %v780_v19 = vpop.permute.xlu1 %779 }
 0x358   : > { %v782_v20 = vmul.f32 %v780_v19, %v776_v18 }
 0x35a   : > { %v1232_v21 = vadd.f32 %v1229_v16, %v782_v20 }
 0x35c   : > { %1233 = vst.msk [vmem:[#allocation4] sm:$0xff] %vm295_vm0, %v1232_v21 }
 0x361   : > { %v1577_v22 = vpop.eup %1576 }
 0x363   : > { %v1235_v23 = vld [vmem:[#allocation4] sm:$0xff] }
 0x364   : > { %v1243_v24 = vmul.f32 %v1577_v22, %v1235_v23 }
 0x366   : > { %1244 = vst.msk [vmem:[%s291_s5] sm:$0xff] %vm295_vm0, %v1243_v24 }
 0x367   : > { %1675 = shalt.err (!%p1672_p4)
}
 0x368   : > { %s1676_s20 = scalar_lea.hbm %s1259_s7, 128  ;;  %s1680_s21 = scalar_lea.hbm %s2025_s3, 1024 }
 0x369   : > { %p1677_p0 = scmp.ne.s32.totalorder %s1259_s7, %s1676_s20  ;;  %p1681_p6 = scmp.lt.s32.totalorder %s1259_s7, %s2025_s3 }
 0x36a   : > { %p1682_p7 = scmp.lt.s32.totalorder %s1680_s21, %s1676_s20 }
 0x36b   : > { %p1678_p1 = pnand %p1677_p0, %p1831_p9 }
 0x36c   : > { %p1683_p8 = por %p1682_p7, %p1681_p6 }
 0x36d   : > { %p1679_p5 = pneg %p1678_p1 }
 0x36f   : > { %p1684_p13 = pnand %p1683_p8, %p1679_p5 }
 0x371   : > { %1687 = shalt.err (!%p1684_p13)
}
 0x372   : > { %1500 = dma.vmem_to_hbm [thread:$0]  (%p1831_p9), %s1262_s10, 128, %s1259_s7, %s1246_s19  }
 0x373 PF: > { %p1517_p2 = scmp.ge.s32.totalorder %s1746_s17, 2  ;;  %s1273_s28 = sand.u32 1, %s1726_s12  }
 0x374   : > { %s1274_s30 = scalar_lea.sflag [#allocation7], %s1273_s28 }
 0x375   : > { %p1513_p3 = pnand %p1517_p2, %p1838_p11 }
 0x377   : > { %p1514_p10 = pneg %p1513_p3 }
 0x379   : > { %1721 = dma.done.wait (%p1514_p10), %s1274_s30, 128  }
 0x37a   : > { %1723 = vsyncadd (%p1514_p10), %s1274_s30, 4294967168  ;;  %s22_s17 = sadd.s32 1, %s1746_s17   ;;  %s2040_s15 = sld [smem:[#allocation15_spill]] }
 0x37b   : > { %p19_p12 = scmp.ge.s32.totalorder %s22_s17, 10   ;;  %s2041_s16 = sld [smem:[#allocation16_spill]] }
 0x37c   : > { %s2042_s12 = smov %s1730_s13  ;;  %s2043_s13 = smov %s1734_s14 }
 0x37d   : > { %s2044_s14 = smov %s1836_s26  ;;  %21 = sbr.rel (!%p19_p12) target bundleno = 10 (0xa), region = 101 }
 0x382   :  { %1279 = vsyncpa [#allocation6], 1 }
 0x383   :  { %1281 = vsyncpa [#allocation6 + $0x1], 1 }
 0x384   :  { %1282 = vsyncpa [#allocation9], 1 }
 0x385   :  { %1284 = vsyncpa [#allocation9 + $0x1], 1 }
 0x386   :  { %1285 = vsyncpa [#allocation7], 1 }
 0x387   :  { %1287 = vsyncpa [#allocation7 + $0x1], 1 }

</bundles_post_ra>
